<compile_context>
chip_gen: v7x
topology: tpu7x:2x2x1
jax: 0.10.0
libtpu: 0.0.40
codegen_flags: <defaults>
</compile_context>

<pallas_src>
import functools
import math

import jax
import jax.numpy as jnp
from jax import lax
from jax.experimental import pallas as pl
from jax.experimental.pallas import tpu as pltpu


_LANE = 128
_DEFAULT_TILE_B = 262144               # batch columns per tile (lane axis)
_LOGITS_TILE_BYTES = 4 * 1024 * 1024   # VMEM budget for one logits tile buffer


def _round_up(x, m):
    return ((x + m - 1) // m) * m


def _smoothing_constants(epsilon, num_classes):
    eps = float(epsilon)
    C = int(num_classes)
    q = eps * eps / (C - 1)            # off-target smoothed value
    p_t = (1.0 - eps) + q              # target smoothed value
    ent = 0.0                          # sum_c smoothed*log(smoothed); xlogy(0,0)=0
    if p_t > 0.0:
        ent += p_t * math.log(p_t)
    if q > 0.0:
        ent += (C - 1) * q * math.log(q)
    return q, ent


def _loss_kernel(logits_ref, tgt_ref, partial_ref, *,
                 epsilon, num_classes, batch, tile_b):
    """Per-tile partial (un-normalised) KL loss.

    logits_ref : (C, TB) native dtype -- classes on sublanes, batch on lanes.
    tgt_ref    : (1, TB) int32; columns >= batch hold garbage (masked below).
    partial_ref: (1, 1) f32 in SMEM -- partial sum for this tile.
    """
    C = int(num_classes)
    eps = float(epsilon)

    x = logits_ref[...].astype(jnp.float32)                 # (C, TB)
    tgt = tgt_ref[...]                                      # (1, TB)

    # ---- dense log-softmax pieces over the class (sublane) axis ------------
    m = jnp.max(x, axis=0, keepdims=True)                   # (1, TB)  XLU
    z = x - m                                               # (C, TB)  VPU
    p = jnp.exp(z)                                          # (C, TB)  dense EUP
    lse = jnp.log(jnp.sum(p, axis=0, keepdims=True))        # (1, TB)
    sum_z = jnp.sum(z, axis=0, keepdims=True)               # (1, TB)

    # gather z at the target class: dense iota compare + axis-0 sum
    cls = lax.broadcasted_iota(jnp.int32, x.shape, 0)       # (C, TB)
    z_tgt = jnp.sum(jnp.where(cls == tgt, z, 0.0), axis=0, keepdims=True)

    # ---- constant-folded label-smoothing algebra (compile-time constants) --
    q, ent = _smoothing_constants(eps, C)
    # per_row = ent - q * sum_c(log_probs) - (1-eps) * log_probs[target]
    #   with log_probs = z - lse,  sum_c(log_probs) = sum_z - C*lse
    per_row = ent - q * (sum_z - float(C) * lse) - (1.0 - eps) * (z_tgt - lse)

    # mask columns beyond the true batch (ragged last tile, no HBM padding)
    col = pl.program_id(0) * tile_b + lax.broadcasted_iota(
        jnp.int32, per_row.shape, 1)
    per_row = jnp.where(col < batch, per_row, 0.0)

    partial_ref[0, 0] = jnp.sum(per_row)


def _sl_kernel(tgt_ref, sl_ref, *, epsilon, num_classes, tile_rows):
    """Smoothed labels in the flat row-major packing of (B, C).

    tgt_ref : (TR, 128) int32, targets repeated C times (padding = -1).
    sl_ref  : (TR, 128) f32, flat (B, C) values.
    """
    C = int(num_classes)
    eps = float(epsilon)
    q, _ = _smoothing_constants(eps, C)

    r = lax.broadcasted_iota(jnp.int32, sl_ref.shape, 0)
    j = lax.broadcasted_iota(jnp.int32, sl_ref.shape, 1)
    flat = (pl.program_id(0) * tile_rows + r) * _LANE + j
    cls = flat % C                                           # class index per lane
    one_hot = cls == tgt_ref[...]
    sl_ref[...] = jnp.where(one_hot, (1.0 - eps) + q, q).astype(jnp.float32)


def _smoothed_labels(targets, *, epsilon, num_classes, batch):
    C = int(num_classes)
    B = int(batch)
    n = B * C
    rows = _round_up(pl.cdiv(n, _LANE), 8)                   # sublane aligned
    tile_rows = min(2048, rows)                              # <= 1 MiB f32 / tile
    rows = _round_up(rows, tile_rows)
    num_tiles = rows // tile_rows

    tgt_flat = jnp.repeat(targets.astype(jnp.int32), C)      # (B*C,)
    tgt_flat = jnp.pad(tgt_flat, (0, rows * _LANE - n), constant_values=-1)
    tgt_flat = tgt_flat.reshape(rows, _LANE)

    kernel = functools.partial(_sl_kernel, epsilon=float(epsilon),
                               num_classes=C, tile_rows=tile_rows)
    sl_flat = pl.pallas_call(
        kernel,
        grid=(num_tiles,),
        in_specs=[pl.BlockSpec((tile_rows, _LANE), lambda i: (i, 0))],
        out_specs=pl.BlockSpec((tile_rows, _LANE), lambda i: (i, 0)),
        out_shape=jax.ShapeDtypeStruct((rows, _LANE), jnp.float32),
        compiler_params=pltpu.CompilerParams(
            dimension_semantics=("parallel",)),
    )(tgt_flat)

    # flat row-major packing of (B, C): cheap reshape/slice, no transpose.
    return sl_flat.reshape(-1)[:n].reshape(B, C)


def lsmoothing_loss(outputs, targets, *, epsilon=0.1, num_classes=4,
                    return_sl=False, tile_b=_DEFAULT_TILE_B):
    """JAX/Pallas equivalent of LSmoothing.forward.

    outputs: (B, C) float logits (any float dtype).  targets: (B,) int ids.
    Returns scalar f32 loss, or (B, C) f32 smoothed labels if return_sl=True.
    """
    B, C = outputs.shape
    assert C == num_classes and C >= 2

    if return_sl:
        return _smoothed_labels(targets, epsilon=epsilon, num_classes=C, batch=B)

    # ---- tile size: lane-aligned, VMEM-bounded, >= 2 tiles when possible ---
    itemsize = jnp.dtype(outputs.dtype).itemsize
    tb_vmem = max(_LANE, (_LOGITS_TILE_BYTES // (C * itemsize)) // _LANE * _LANE)
    tb = max(_LANE, (int(tile_b) // _LANE) * _LANE)
    tb = min(tb, tb_vmem)
    half_b = max(_LANE, _round_up(pl.cdiv(B, 2), _LANE))     # v7x: feed both TCs
    tb = min(tb, half_b)
    num_tiles = pl.cdiv(B, tb)

    # Lane-dense layout: classes on sublanes, batch on lanes.  No padding --
    # the ragged last tile is masked inside the kernel by the column index.
    logits_t = outputs.T                                     # (C, B)
    tgt = targets.astype(jnp.int32).reshape(1, B)

    kernel = functools.partial(_loss_kernel, epsilon=float(epsilon),
                               num_classes=C, batch=B, tile_b=tb)
    cost = pl.CostEstimate(
        flops=int((8 * C + 12) * B),
        transcendentals=int((C + 1) * B),
        bytes_accessed=int(B * C * itemsize + B * 4 + num_tiles * 4))

    partials = pl.pallas_call(
        kernel,
        grid=(num_tiles,),
        in_specs=[
            pl.BlockSpec((C, tb), lambda i: (0, i)),
            pl.BlockSpec((1, tb), lambda i: (0, i)),
        ],
        out_specs=pl.BlockSpec((1, 1), lambda i: (i, 0),
                               memory_space=pltpu.MemorySpace.SMEM),
        out_shape=jax.ShapeDtypeStruct((num_tiles, 1), jnp.float32),
        compiler_params=pltpu.CompilerParams(
            dimension_semantics=("parallel",),
            vmem_limit_bytes=32 * 1024 * 1024),
        cost_estimate=cost,
    )(logits_t, tgt)

    # batchmean normalisation with a compile-time constant scale.
    return jnp.sum(partials) * (1.0 / B)


def _reference(outputs, targets, eps, C):
    one_hot = jax.nn.one_hot(targets, C, dtype=jnp.float32)
    smoothed = (1 - eps) * one_hot + eps * (eps / (C - 1))
    log_probs = jax.nn.log_softmax(outputs.astype(jnp.float32), axis=1)
    loss = jnp.sum(smoothed * (jnp.log(smoothed) - log_probs)) / outputs.shape[0]
    return loss, smoothed


if __name__ == "__main__":
    key = jax.random.PRNGKey(0)
    k1, k2, k3, k4 = jax.random.split(key, 4)

    # small shapes consistent with the module
    B, C = 8, 4
    eps = 0.1
    outputs = jax.random.normal(k1, (B, C), dtype=jnp.float32)
    targets = jax.random.randint(k2, (B,), 0, C, dtype=jnp.int32)

    loss = lsmoothing_loss(outputs, targets, epsilon=eps, num_classes=C)
    jax.block_until_ready(loss)
    ref_loss, ref_sl = _reference(outputs, targets, eps, C)
    assert jnp.allclose(loss, ref_loss, rtol=1e-5, atol=1e-5), (loss, ref_loss)

    sl = lsmoothing_loss(outputs, targets, epsilon=eps, num_classes=C,
                         return_sl=True)
    jax.block_until_ready(sl)
    assert sl.shape == (B, C)
    assert jnp.allclose(sl, ref_sl, rtol=1e-5, atol=1e-6)

    # exercise the multi-tile / ragged-last-tile path (no HBM padding)
    B2 = 300
    outputs2 = jax.random.normal(k3, (B2, C), dtype=jnp.float32)
    targets2 = jax.random.randint(k4, (B2,), 0, C, dtype=jnp.int32)
    loss2 = lsmoothing_loss(outputs2, targets2, epsilon=eps, num_classes=C,
                            tile_b=128)
    jax.block_until_ready(loss2)
    ref_loss2, _ = _reference(outputs2, targets2, eps, C)
    assert jnp.allclose(loss2, ref_loss2, rtol=1e-5, atol=1e-5), (loss2, ref_loss2)

    print("KERNEL_OK")
</pallas_src>

<mosaic_0001>
module attributes {stable_mosaic.version = 11 : i64} {
  func.func @_loss_kernel(%arg0: i32, %arg1: memref<4x128xf32, #tpu.memory_space<vmem>>, %arg2: memref<1x128xi32, #tpu.memory_space<vmem>>, %arg3: memref<1x1xf32, #tpu.memory_space<smem>>) attributes {dimension_semantics = [#tpu.dimension_semantics<parallel>], iteration_bounds = array<i64: 1>, scalar_prefetch = 0 : i64, scratch_operands = 0 : i64, tpu.core_type = #tpu.core_type<tc>, window_params = [{transform_indices = @transform_0, window_bounds = array<i64: 4, 128>}, {transform_indices = @transform_1, window_bounds = array<i64: 1, 128>}, {transform_indices = @transform_2, window_bounds = array<i64: 1, 1>}]} {
    %c0 = arith.constant 0 : index
    %c0_0 = arith.constant 0 : index
    %0 = vector.load %arg1[%c0, %c0_0] : memref<4x128xf32, #tpu.memory_space<vmem>>, vector<4x128xf32>
    %c0_1 = arith.constant 0 : index
    %c0_2 = arith.constant 0 : index
    %1 = vector.load %arg2[%c0_1, %c0_2] : memref<1x128xi32, #tpu.memory_space<vmem>>, vector<1x128xi32>
    %cst = arith.constant dense<0xFF800000> : vector<128xf32>
    %2 = vector.multi_reduction <maximumf>, %0, %cst [0] : vector<4x128xf32> to vector<128xf32>
    %3 = vector.shape_cast %2 : vector<128xf32> to vector<1x128xf32>
    %4 = vector.broadcast %3 : vector<1x128xf32> to vector<4x128xf32>
    %5 = arith.subf %0, %4 : vector<4x128xf32>
    %6 = math.exp %5 : vector<4x128xf32>
    %cst_3 = arith.constant dense<0.000000e+00> : vector<128xf32>
    %7 = vector.multi_reduction <add>, %6, %cst_3 [0] : vector<4x128xf32> to vector<128xf32>
    %8 = vector.shape_cast %7 : vector<128xf32> to vector<1x128xf32>
    %9 = math.log %8 : vector<1x128xf32>
    %cst_4 = arith.constant dense<0.000000e+00> : vector<128xf32>
    %10 = vector.multi_reduction <add>, %5, %cst_4 [0] : vector<4x128xf32> to vector<128xf32>
    %11 = vector.shape_cast %10 : vector<128xf32> to vector<1x128xf32>
    %12 = tpu.iota {dimensions = array<i32: 0>} : vector<4x128xi32>
    %13 = vector.broadcast %1 : vector<1x128xi32> to vector<4x128xi32>
    %14 = arith.cmpi eq, %12, %13 : vector<4x128xi32>
    %cst_5 = arith.constant 0.000000e+00 : f32
    %15 = vector.broadcast %cst_5 : f32 to vector<4x128xf32>
    %16 = arith.select %14, %5, %15 : vector<4x128xi1>, vector<4x128xf32>
    %cst_6 = arith.constant dense<0.000000e+00> : vector<128xf32>
    %17 = vector.multi_reduction <add>, %16, %cst_6 [0] : vector<4x128xf32> to vector<128xf32>
    %18 = vector.shape_cast %17 : vector<128xf32> to vector<1x128xf32>
    %cst_7 = arith.constant 4.000000e+00 : f32
    %19 = vector.broadcast %cst_7 : f32 to vector<1x128xf32>
    %20 = arith.mulf %19, %9 : vector<1x128xf32>
    %21 = arith.subf %11, %20 : vector<1x128xf32>
    %cst_8 = arith.constant 0.00333333341 : f32
    %22 = vector.broadcast %cst_8 : f32 to vector<1x128xf32>
    %23 = arith.mulf %22, %21 : vector<1x128xf32>
    %cst_9 = arith.constant -0.148873985 : f32
    %24 = vector.broadcast %cst_9 : f32 to vector<1x128xf32>
    %25 = arith.subf %24, %23 : vector<1x128xf32>
    %26 = arith.subf %18, %9 : vector<1x128xf32>
    %cst_10 = arith.constant 0.899999976 : f32
    %27 = vector.broadcast %cst_10 : f32 to vector<1x128xf32>
    %28 = arith.mulf %27, %26 : vector<1x128xf32>
    %29 = arith.subf %25, %28 : vector<1x128xf32>
    %c128_i32 = arith.constant 128 : i32
    %30 = arith.muli %arg0, %c128_i32 : i32
    %31 = tpu.iota {dimensions = array<i32: 1>} : vector<1x128xi32>
    %32 = vector.broadcast %30 : i32 to vector<1x128xi32>
    %33 = arith.addi %32, %31 : vector<1x128xi32>
    %c8_i32 = arith.constant 8 : i32
    %34 = vector.broadcast %c8_i32 : i32 to vector<1x128xi32>
    %35 = arith.cmpi slt, %33, %34 : vector<1x128xi32>
    %cst_11 = arith.constant 0.000000e+00 : f32
    %36 = vector.broadcast %cst_11 : f32 to vector<1x128xf32>
    %37 = arith.select %35, %29, %36 : vector<1x128xi1>, vector<1x128xf32>
    %38 = vector.shape_cast %37 : vector<1x128xf32> to vector<1x1x128xf32>
    %cst_12 = arith.constant dense<0.000000e+00> : vector<1xf32>
    %39 = vector.multi_reduction <add>, %38, %cst_12 [1, 2] : vector<1x1x128xf32> to vector<1xf32>
    %40 = vector.shape_cast %39 : vector<1xf32> to vector<1x1x1xf32>
    %41 = vector.extract %40[0, 0, 0] : f32 from vector<1x1x1xf32>
    %c0_13 = arith.constant 0 : index
    %c0_14 = arith.constant 0 : index
    %42 = memref.load %arg3[%c0_13, %c0_14] : memref<1x1xf32, #tpu.memory_space<smem>>
    memref.store %41, %arg3[%c0_13, %c0_14] : memref<1x1xf32, #tpu.memory_space<smem>>
    return
  }
  func.func @transform_0(%arg0: i32) -> (i32, i32) {
    %c0_i32 = arith.constant 0 : i32
    %c0_i32_0 = arith.constant 0 : i32
    return %c0_i32, %arg0 : i32, i32
  }
  func.func @transform_1(%arg0: i32) -> (i32, i32) {
    %c0_i32 = arith.constant 0 : i32
    %c0_i32_0 = arith.constant 0 : i32
    return %c0_i32, %arg0 : i32, i32
  }
  func.func @transform_2(%arg0: i32) -> (i32, i32) {
    %c0_i32 = arith.constant 0 : i32
    %c0_i32_0 = arith.constant 0 : i32
    return %arg0, %c0_i32 : i32, i32
  }
}

</mosaic_0001>

<bundles_post_ra>
// kernel: tpu_custom_call.1
= control target key start
LH: loop header
LB: loop body
LE: loop exit
PB: predicated region body
PF: predicated region fallthrough
CT: control target
= control target key end

     0   :  { %7 = vsyncpa [#allocation3], 0  ;;  %s202_s0 = inlined_call_operand.hbm [shape: f32[4,8], index: 0, kind: input, shape index: {}]   ;;  %s203_s1 = inlined_call_operand.vmem [shape: s32[1,8], index: 1, kind: input, shape index: {}]   ;;  %s204_s2 = inlined_call_operand.hbm [shape: f32[1,1], index: 2, kind: output, shape index: {}]  }
   0x1   :  { %8 = vsyncpa [#allocation4], 0  ;;  %s154_s9 = smov [#allocation2]   ;;  %s118_s13 = scalar_lea.hbm %s202_s0, 64 }
   0x2   :  { %s15_s10 = sshll.u32 %s154_s9, 4  ;;  %p119_p0 = scmp.ne.s32.totalorder %s202_s0, %s118_s13  ;;  %s16_s10 = int_to_ptr.vmem [resolvable:$true] %s15_s10 }
   0x3   :  { %p122_p1 = scmp.lt.u32.totalorder %s118_s13, %s202_s0 }
   0x5   :  { %p124_p2 = pnand %p122_p1, %p119_p0 }
   0x7   :  { %127 = shalt.err (!%p124_p2)
}
   0x8   :  { %s128_s18 = scalar_lea.vmem %s16_s10, 64  ;;  %p133_p4 = scmp.lt.s32.totalorder %s16_s10, %s16_s10 }
   0x9   :  { %p129_p3 = scmp.ne.s32.totalorder %s16_s10, %s128_s18  ;;  %p134_p5 = scmp.lt.s32.totalorder %s128_s18, %s128_s18 }
   0xb   :  { %p135_p6 = por %p134_p5, %p133_p4 }
   0xd   :  { %p136_p7 = pnand %p135_p6, %p129_p3 }
   0xf   :  { %139 = shalt.err (!%p136_p7)
}
  0x10   :  { %18 = dma.hbm_to_vmem [thread:$0]  %s202_s0, 64, %s16_s10, [#allocation3]  }
  0x11   :  { %150 = dma.done.wait [#allocation3], 64  }
  0x12   :  { %151 = vsyncadd [#allocation3], 4294967232  ;;  %vm26_vm0 = vcmask 1043456   ;;  %v24_v0 = vld [vmem:[#allocation2] sm:$0xf]  ;;  %v53_v9 = vlaneseq  ;;  %vm82_vm3 = vcmask 1040384  }
  0x13   :  { %v27_v1 = vsel %vm26_vm0, %v24_v0, -inf  ;;  %v109_v12 = vld [vmem:[%s203_s1] ss:$0 sm:$0xff]  ;;  %s140_s24 = scalar_lea.hbm %s204_s2, 16 }
  0x14   :  { %v28_v2 = vrot.slane %v27_v1, 4  ;;  %v54_v11 = vshrl.u32 %v53_v9, 7  ;;  %v77_v41 = vand.u32 127, %v53_v9  ;;  %p141_p8 = scmp.ne.s32.totalorder %s204_s2, %s140_s24  ;;  %p144_p9 = scmp.lt.u32.totalorder %s140_s24, %s204_s2 }
  0x16   :  { %v29_v3 = vmax.f32 %v27_v1, %v28_v2  ;;  %vm59_vm1 = vcmp.eq.s32.totalorder %v54_v11, %v109_v12  ;;  %vm80_vm2 = vcmp.lt.s32.totalorder %v77_v41, 8  ;;  %p146_p10 = pnand %p144_p9, %p141_p8 }
  0x18   :  { %v30_v4 = vrot.slane %v29_v3, 2 }
  0x1a   :  { %v31_v5 = vmax.f32 %v29_v3, %v30_v4 }
  0x1c   :  { %v32_v6 = vrot.slane %v31_v5, 1 }
  0x1e   :  { %v33_v7 = vmax.f32 %v31_v5, %v32_v6 }
  0x20   :  { %v34_v8 = vsub.f32 %v24_v0, %v33_v7 }
  0x22   :  { %v35_v10 = vmul.f32 1.442695, %v34_v8  ;;  %v60_v13 = vsel %vm59_vm1, %v34_v8, 0.0  ;;  %v46_v18 = vsel %vm26_vm0, %v34_v8, 0.0 }
  0x23   :  { %v61_v15 = vsel %vm26_vm0, %v60_v13, 0.0  ;;  %v47_v21 = vrot.slane %v46_v18, 4 }
  0x24   :  { %114 = vpow2.f32 %v35_v10  ;;  %v62_v19 = vrot.slane %v61_v15, 4 }
  0x25   :  { %v48_v25 = vadd.f32 %v47_v21, %v46_v18 }
  0x26   :  { %v63_v23 = vadd.f32 %v62_v19, %v61_v15 }
  0x27   :  { %v49_v29 = vrot.slane %v48_v25, 2 }
  0x28   :  { %v64_v27 = vrot.slane %v63_v23, 2 }
  0x29   :  { %v50_v31 = vadd.f32 %v49_v29, %v48_v25 }
  0x2a   :  { %v65_v30 = vadd.f32 %v64_v27, %v63_v23 }
  0x2b   :  { %v51_v33 = vrot.slane %v50_v31, 1 }
  0x2c   :  { %v66_v32 = vrot.slane %v65_v30, 1 }
  0x2d   :  { %v52_v37 = vadd.f32 %v51_v33, %v50_v31 }
  0x2e   :  { %v115_v14 = vpop.eup %114  ;;  %v67_v34 = vadd.f32 %v66_v32, %v65_v30 }
  0x2f   :  { %v37_v16 = vsel %vm26_vm0, %v115_v14, 0.0 }
  0x30   :  { %v38_v17 = vrot.slane %v37_v16, 4 }
  0x32   :  { %v39_v20 = vadd.f32 %v38_v17, %v37_v16 }
  0x34   :  { %v40_v22 = vrot.slane %v39_v20, 2 }
  0x36   :  { %v41_v24 = vadd.f32 %v40_v22, %v39_v20 }
  0x38   :  { %v42_v26 = vrot.slane %v41_v24, 1 }
  0x3a   :  { %v43_v28 = vadd.f32 %v42_v26, %v41_v24 }
  0x3c   :  { %116 = vlog2.f32 %v43_v28 }
  0x46   :  { %v117_v35 = vpop.eup %116 }
  0x47   :  { %v45_v36 = vmul.f32 0.6931472, %v117_v35 }
  0x49   :  { %v68_v38 = vmul.f32 4.0, %v45_v36  ;;  %v72_v39 = vsub.f32 %v67_v34, %v45_v36 }
  0x4b   :  { %v69_v40 = vsub.f32 %v52_v37, %v68_v38  ;;  %v73_v43 = vmul.f32 0.9, %v72_v39 }
  0x4d   :  { %v70_v42 = vmul.f32 0.0033333334, %v69_v40 }
  0x4f   :  { %v71_v44 = vsub.f32 -0.14887398, %v70_v42 }
  0x51   :  { %v74_v45 = vsub.f32 %v71_v44, %v73_v43 }
  0x53   :  { %v81_v46 = vsel %vm80_vm2, %v74_v45, 0.0 }
  0x54   :  { %v83_v47 = vsel %vm82_vm3, %v81_v46, 0.0 }
  0x55   :  { %84 = vadd.xlane.f32.xlu0 %v83_v47 }
  0xe2   :  { %v85_v48 = vpop.xlane.xlu0 %84 }
  0xe3   :  { %v86_v49 = vrot.slane %v85_v48, 4 }
  0xe5   :  { %v87_v50 = vadd.f32 %v86_v49, %v85_v48 }
  0xe7   :  { %v88_v51 = vrot.slane %v87_v50, 2 }
  0xe9   :  { %v89_v52 = vadd.f32 %v88_v51, %v87_v50 }
  0xeb   :  { %v90_v53 = vrot.slane %v89_v52, 1 }
  0xed   :  { %v91_v54 = vadd.f32 %v90_v53, %v89_v52 }
  0xef   :  { %110 = vpush %v91_v54 }
 0x120   :  { %s111_s0 = spop %110 }
 0x121   :  { %94 = sst [smem:[#allocation5]] %s111_s0 }
 0x122   :  { %149 = shalt.err (!%p146_p10)
}
 0x123   :  { %s155_s29 = smov [#allocation5]  }
 0x124   :  { %102 = dma.smem_to_hbm %s155_s29, 16, %s204_s2, [#allocation4]  }
 0x125   :  { %152 = dma.done.wait [#allocation4], 16  }
 0x126   :  { %153 = vsyncadd [#allocation4], 4294967280 }
 0x127   :  { %106 = sfence }
 0x128   :  { %107 = vsyncpa [#allocation3], 1 }
 0x129   :  { %108 = vsyncpa [#allocation4], 1 }

</bundles_post_ra>
